<compile_context>
chip_gen: v7x
topology: tpu7x:2x2x1
jax: 0.10.0
libtpu: 0.0.40
codegen_flags: <defaults>
</compile_context>

<pallas_src>
import jax
import jax.numpy as jnp
from jax.experimental import pallas as pl
from jax.experimental.pallas import tpu as pltpu

N_WILL = 13                 # WillpowerMetrics fields
N_RES = 9                   # ResistanceMetrics fields
N_FEAT = N_WILL + N_RES     # 22 merged feature rows


def _round_up(x, m):
    return -(-x // m) * m


# ----------------------------------------------------------------------------
# Kernel: merged metrics (22, TS, TL) -> willpower score (TS, TL)
# Feature-row layout (batch on the last two dims = sublanes x lanes):
#   0..12 : reflection, mindfulness, feedback, clarity, specificity, alignment,
#           intrinsic_mot, extrinsic_mot, physical_e, mental_e, emotional_e,
#           consistency, focus
#   13..21: tempt_avail, tempt_strength, distr_freq, distr_impact,
#           phys_fatigue, mental_fatigue, emot_fatigue, stressors, perceived_stress
# ----------------------------------------------------------------------------
def willpower_kernel(m_ref, out_ref):
    # Per-feature slices straight from the ref; each is a dense (TS, TL) tile
    # with full (8, 128) vreg occupancy (no 1-sublane strided loads).
    awareness   = m_ref[0] + m_ref[1] + m_ref[2]
    clarity     = m_ref[3] + m_ref[4] + m_ref[5]
    motivation  = m_ref[6] + m_ref[7]
    energy      = m_ref[8] + m_ref[9] + m_ref[10]
    performance = m_ref[11] + m_ref[12]
    # (/3 * /3 * /2 * /2) folded into one *(1/36) scale (last-ulp reorder only)
    positive = awareness * clarity * motivation * energy * performance * (1.0 / 36.0)

    temptation  = m_ref[13] * m_ref[14]
    distraction = m_ref[15] * m_ref[16]
    fatigue     = m_ref[17] + m_ref[18] + m_ref[19]
    stress      = m_ref[20] * m_ref[21]
    negative = temptation + distraction + fatigue + stress

    # Exact divide (keep rtol=1e-5 fidelity; no approx reciprocal here).
    out_ref[...] = positive / (negative + 1e-6)


def pack_metrics(willpower_metrics, resistance_metrics):
    """ONE fused producer: (B,13),(B,9) -> (22,B) f32 feature-major layout.

    In production, emit metrics directly in (22, B) layout and call
    willpower_score_packed to skip this copy entirely (it roughly triples HBM
    traffic for this memory-bound op when paid on every call)."""
    wm = jnp.asarray(willpower_metrics, jnp.float32)
    rm = jnp.asarray(resistance_metrics, jnp.float32)
    return jnp.concatenate([wm, rm], axis=1).T            # (22, B)


def willpower_score_packed(m, *, lanes=512, sub_tile=None):
    """Preferred ABI: m is the merged (22, B) f32 metrics array.

    Returns willpower scores of shape (B, 1)."""
    m = jnp.asarray(m, jnp.float32)
    n_feat, B = m.shape
    assert n_feat == N_FEAT, f"expected {N_FEAT} feature rows, got {n_feat}"

    L = _round_up(max(int(lanes), 128), 128)               # lane width
    s_needed = -(-B // L)                                   # sublane rows needed
    if sub_tile is None:
        # Target ~32K batch elems / step (L=512, TS=64 -> ~2.9 MiB input tile,
        # double-buffered well inside the 32 MiB scoped-VMEM default on
        # v5e/v6e/v7x) to amortize the ~0.35us per-step overhead, while keeping
        # >=2 grid steps when possible so v7x shards the parallel batch axis
        # across both TensorCores.
        sub_tile = min(64, max(8, _round_up(-(-s_needed // 2), 8)))
    ts = _round_up(max(int(sub_tile), 8), 8)

    s_total = _round_up(max(s_needed, 1), ts)
    b_pad = s_total * L
    if b_pad != B:
        # Explicit zero pad: padded columns give 0/(0+1e-6)=0, never inf/NaN.
        # Under jit this pad fuses with the upstream pack; with a native
        # (22, B) producer it disappears for batch sizes already tile-aligned.
        m = jnp.pad(m, ((0, 0), (0, b_pad - B)))
    m3 = m.reshape(N_FEAT, s_total, L)                      # free row-major reshape

    out = pl.pallas_call(
        willpower_kernel,
        out_shape=jax.ShapeDtypeStruct((s_total, L), jnp.float32),
        grid=(s_total // ts,),
        # First block dim 22 == full array extent (allowed even though 22%8!=0);
        # last two dims are (multiple of 8, multiple of 128).
        in_specs=[pl.BlockSpec((N_FEAT, ts, L), lambda i: (0, i, 0))],
        out_specs=pl.BlockSpec((ts, L), lambda i: (i, 0)),
        compiler_params=pltpu.CompilerParams(
            dimension_semantics=("parallel",)),
    )(m3)                                                   # (s_total, L)

    return out.reshape(b_pad)[:B].reshape(B, 1)


def _willpower_forward_jnp(willpower_metrics, resistance_metrics):
    """Plain-XLA path (single fusion) — wins for small/medium B or when the
    metrics arrive in (B,13)/(B,9) layout and the repack copy is not free."""
    wm = jnp.asarray(willpower_metrics, jnp.float32)
    rm = jnp.asarray(resistance_metrics, jnp.float32)
    awareness   = (wm[:, 0] + wm[:, 1] + wm[:, 2]) / 3.0
    clarity     = (wm[:, 3] + wm[:, 4] + wm[:, 5]) / 3.0
    motivation  = (wm[:, 6] + wm[:, 7]) / 2.0
    energy      =  wm[:, 8] + wm[:, 9] + wm[:, 10]
    performance = (wm[:, 11] + wm[:, 12]) / 2.0
    positive = awareness * clarity * motivation * energy * performance
    negative = (rm[:, 0] * rm[:, 1] + rm[:, 2] * rm[:, 3]
                + rm[:, 4] + rm[:, 5] + rm[:, 6] + rm[:, 7] * rm[:, 8])
    return (positive / (negative + 1e-6))[:, None]


def willpower_forward(willpower_metrics, resistance_metrics,
                      use_pallas=None, lanes=512, sub_tile=None):
    """Convenience entry for (B,13)/(B,9) inputs.

    The Pallas path pays a repack copy here; prefer producing the metrics in
    (22, B) layout and calling willpower_score_packed directly."""
    B = willpower_metrics.shape[0]
    if use_pallas is None:
        use_pallas = B >= 32768          # repack overhead only amortizes at large B
    if use_pallas:
        m = pack_metrics(willpower_metrics, resistance_metrics)
        return willpower_score_packed(m, lanes=lanes, sub_tile=sub_tile)
    return _willpower_forward_jnp(willpower_metrics, resistance_metrics)


def init_unused_params(hidden_size, key):
    """Deterministic init of the module's layers (unused in forward, kept for fidelity)."""
    ks = jax.random.split(key, 8)

    def lin(k, in_f, out_f):
        kw, kb = jax.random.split(k)
        bound = 1.0 / jnp.sqrt(in_f)
        return {
            "w": jax.random.uniform(kw, (out_f, in_f), jnp.float32, -bound, bound),
            "b": jax.random.uniform(kb, (out_f,), jnp.float32, -bound, bound),
        }

    h = hidden_size
    bnd = 1.0 / jnp.sqrt(h)
    return {
        "awareness_layer":   lin(ks[0], 3, h),
        "clarity_layer":     lin(ks[1], 3, h),
        "motivation_layer":  lin(ks[2], 2, h),
        "energy_layer":      lin(ks[3], 3, h),
        "performance_layer": lin(ks[4], 2, h),
        "resistance_layer":  lin(ks[5], 9, h),
        "reflection_layer": {  # LSTM(h, h)
            "w_ih": jax.random.uniform(ks[6], (4 * h, h), jnp.float32, -bnd, bnd),
            "w_hh": jax.random.uniform(ks[6], (4 * h, h), jnp.float32, -bnd, bnd),
            "b_ih": jnp.zeros((4 * h,), jnp.float32),
            "b_hh": jnp.zeros((4 * h,), jnp.float32),
        },
        "adaptation_layer":  lin(ks[7], h, h),
    }


def reference_forward(wm, rm):
    awareness   = (wm[:, 0] + wm[:, 1] + wm[:, 2]) / 3.0
    clarity     = (wm[:, 3] + wm[:, 4] + wm[:, 5]) / 3.0
    motivation  = (wm[:, 6] + wm[:, 7]) / 2.0
    energy      =  wm[:, 8] + wm[:, 9] + wm[:, 10]
    performance = (wm[:, 11] + wm[:, 12]) / 2.0
    positive = awareness * clarity * motivation * energy * performance
    negative = (rm[:, 0] * rm[:, 1] + rm[:, 2] * rm[:, 3]
                + rm[:, 4] + rm[:, 5] + rm[:, 6] + rm[:, 7] * rm[:, 8])
    return (positive / (negative + 1e-6))[:, None]


if __name__ == "__main__":
    key = jax.random.PRNGKey(0)
    k_wm, k_rm, k_params = jax.random.split(key, 3)

    # Small batch of metric snapshots; non-tile-multiple to exercise padding,
    # small (lanes=128, sub_tile=8) tiles so the grid has 2 pipelined steps.
    B = 2000
    willpower_metrics = jax.random.uniform(k_wm, (B, 13), jnp.float32)
    resistance_metrics = jax.random.uniform(k_rm, (B, 9), jnp.float32)

    # Deterministic (unused-in-forward) layer parameters, mirroring __init__.
    _params = init_unused_params(hidden_size=32, key=k_params)

    # TODO(synk): experience_buffer bookkeeping, .item() host sync, and the
    # self_reflect / adapt_learning control flow are host-side stateful Python
    # logic, not tensor compute; they have no Pallas equivalent and are omitted.

    ref = reference_forward(willpower_metrics, resistance_metrics)

    # Preferred ABI: metrics already merged in (22, B) feature-major layout.
    packed = pack_metrics(willpower_metrics, resistance_metrics)
    out = willpower_score_packed(packed, lanes=128, sub_tile=8)
    out = jax.block_until_ready(out)
    assert out.shape == (B, 1)
    assert jnp.allclose(out, ref, rtol=1e-5, atol=1e-6), (out, ref)

    # Convenience wrapper, Pallas path forced on (exercises pack + default tiles).
    out2 = willpower_forward(willpower_metrics, resistance_metrics,
                             use_pallas=True, lanes=128)
    out2 = jax.block_until_ready(out2)
    assert jnp.allclose(out2, ref, rtol=1e-5, atol=1e-6)

    # Small-batch (scalar PyTorch-style) fallback path sanity check.
    out_small = willpower_forward(willpower_metrics[:2], resistance_metrics[:2])
    out_small = jax.block_until_ready(out_small)
    assert jnp.allclose(out_small, ref[:2], rtol=1e-5, atol=1e-6)

    print("KERNEL_OK")
</pallas_src>

<mosaic_0001>
module attributes {stable_mosaic.version = 11 : i64} {
  func.func @willpower_kernel(%arg0: i32, %arg1: memref<22x8x128xf32, #tpu.memory_space<vmem>>, %arg2: memref<8x128xf32, #tpu.memory_space<vmem>>) attributes {dimension_semantics = [#tpu.dimension_semantics<parallel>], iteration_bounds = array<i64: 2>, scalar_prefetch = 0 : i64, scratch_operands = 0 : i64, tpu.core_type = #tpu.core_type<tc>, window_params = [{transform_indices = @transform_0, window_bounds = array<i64: 22, 8, 128>}, {transform_indices = @transform_1, window_bounds = array<i64: 8, 128>}]} {
    %c0 = arith.constant 0 : index
    %c0_0 = arith.constant 0 : index
    %c0_1 = arith.constant 0 : index
    %0 = vector.load %arg1[%c0, %c0_0, %c0_1] : memref<22x8x128xf32, #tpu.memory_space<vmem>>, vector<1x8x128xf32>
    %1 = vector.shape_cast %0 : vector<1x8x128xf32> to vector<8x128xf32>
    %c1 = arith.constant 1 : index
    %c0_2 = arith.constant 0 : index
    %c0_3 = arith.constant 0 : index
    %2 = vector.load %arg1[%c1, %c0_2, %c0_3] : memref<22x8x128xf32, #tpu.memory_space<vmem>>, vector<1x8x128xf32>
    %3 = vector.shape_cast %2 : vector<1x8x128xf32> to vector<8x128xf32>
    %4 = arith.addf %1, %3 : vector<8x128xf32>
    %c2 = arith.constant 2 : index
    %c0_4 = arith.constant 0 : index
    %c0_5 = arith.constant 0 : index
    %5 = vector.load %arg1[%c2, %c0_4, %c0_5] : memref<22x8x128xf32, #tpu.memory_space<vmem>>, vector<1x8x128xf32>
    %6 = vector.shape_cast %5 : vector<1x8x128xf32> to vector<8x128xf32>
    %7 = arith.addf %4, %6 : vector<8x128xf32>
    %c3 = arith.constant 3 : index
    %c0_6 = arith.constant 0 : index
    %c0_7 = arith.constant 0 : index
    %8 = vector.load %arg1[%c3, %c0_6, %c0_7] : memref<22x8x128xf32, #tpu.memory_space<vmem>>, vector<1x8x128xf32>
    %9 = vector.shape_cast %8 : vector<1x8x128xf32> to vector<8x128xf32>
    %c4 = arith.constant 4 : index
    %c0_8 = arith.constant 0 : index
    %c0_9 = arith.constant 0 : index
    %10 = vector.load %arg1[%c4, %c0_8, %c0_9] : memref<22x8x128xf32, #tpu.memory_space<vmem>>, vector<1x8x128xf32>
    %11 = vector.shape_cast %10 : vector<1x8x128xf32> to vector<8x128xf32>
    %12 = arith.addf %9, %11 : vector<8x128xf32>
    %c5 = arith.constant 5 : index
    %c0_10 = arith.constant 0 : index
    %c0_11 = arith.constant 0 : index
    %13 = vector.load %arg1[%c5, %c0_10, %c0_11] : memref<22x8x128xf32, #tpu.memory_space<vmem>>, vector<1x8x128xf32>
    %14 = vector.shape_cast %13 : vector<1x8x128xf32> to vector<8x128xf32>
    %15 = arith.addf %12, %14 : vector<8x128xf32>
    %c6 = arith.constant 6 : index
    %c0_12 = arith.constant 0 : index
    %c0_13 = arith.constant 0 : index
    %16 = vector.load %arg1[%c6, %c0_12, %c0_13] : memref<22x8x128xf32, #tpu.memory_space<vmem>>, vector<1x8x128xf32>
    %17 = vector.shape_cast %16 : vector<1x8x128xf32> to vector<8x128xf32>
    %c7 = arith.constant 7 : index
    %c0_14 = arith.constant 0 : index
    %c0_15 = arith.constant 0 : index
    %18 = vector.load %arg1[%c7, %c0_14, %c0_15] : memref<22x8x128xf32, #tpu.memory_space<vmem>>, vector<1x8x128xf32>
    %19 = vector.shape_cast %18 : vector<1x8x128xf32> to vector<8x128xf32>
    %20 = arith.addf %17, %19 : vector<8x128xf32>
    %c8 = arith.constant 8 : index
    %c0_16 = arith.constant 0 : index
    %c0_17 = arith.constant 0 : index
    %21 = vector.load %arg1[%c8, %c0_16, %c0_17] : memref<22x8x128xf32, #tpu.memory_space<vmem>>, vector<1x8x128xf32>
    %22 = vector.shape_cast %21 : vector<1x8x128xf32> to vector<8x128xf32>
    %c9 = arith.constant 9 : index
    %c0_18 = arith.constant 0 : index
    %c0_19 = arith.constant 0 : index
    %23 = vector.load %arg1[%c9, %c0_18, %c0_19] : memref<22x8x128xf32, #tpu.memory_space<vmem>>, vector<1x8x128xf32>
    %24 = vector.shape_cast %23 : vector<1x8x128xf32> to vector<8x128xf32>
    %25 = arith.addf %22, %24 : vector<8x128xf32>
    %c10 = arith.constant 10 : index
    %c0_20 = arith.constant 0 : index
    %c0_21 = arith.constant 0 : index
    %26 = vector.load %arg1[%c10, %c0_20, %c0_21] : memref<22x8x128xf32, #tpu.memory_space<vmem>>, vector<1x8x128xf32>
    %27 = vector.shape_cast %26 : vector<1x8x128xf32> to vector<8x128xf32>
    %28 = arith.addf %25, %27 : vector<8x128xf32>
    %c11 = arith.constant 11 : index
    %c0_22 = arith.constant 0 : index
    %c0_23 = arith.constant 0 : index
    %29 = vector.load %arg1[%c11, %c0_22, %c0_23] : memref<22x8x128xf32, #tpu.memory_space<vmem>>, vector<1x8x128xf32>
    %30 = vector.shape_cast %29 : vector<1x8x128xf32> to vector<8x128xf32>
    %c12 = arith.constant 12 : index
    %c0_24 = arith.constant 0 : index
    %c0_25 = arith.constant 0 : index
    %31 = vector.load %arg1[%c12, %c0_24, %c0_25] : memref<22x8x128xf32, #tpu.memory_space<vmem>>, vector<1x8x128xf32>
    %32 = vector.shape_cast %31 : vector<1x8x128xf32> to vector<8x128xf32>
    %33 = arith.addf %30, %32 : vector<8x128xf32>
    %34 = arith.mulf %7, %15 : vector<8x128xf32>
    %35 = arith.mulf %34, %20 : vector<8x128xf32>
    %36 = arith.mulf %35, %28 : vector<8x128xf32>
    %37 = arith.mulf %36, %33 : vector<8x128xf32>
    %cst = arith.constant 0.027777778 : f32
    %38 = vector.broadcast %cst : f32 to vector<8x128xf32>
    %39 = arith.mulf %37, %38 : vector<8x128xf32>
    %c13 = arith.constant 13 : index
    %c0_26 = arith.constant 0 : index
    %c0_27 = arith.constant 0 : index
    %40 = vector.load %arg1[%c13, %c0_26, %c0_27] : memref<22x8x128xf32, #tpu.memory_space<vmem>>, vector<1x8x128xf32>
    %41 = vector.shape_cast %40 : vector<1x8x128xf32> to vector<8x128xf32>
    %c14 = arith.constant 14 : index
    %c0_28 = arith.constant 0 : index
    %c0_29 = arith.constant 0 : index
    %42 = vector.load %arg1[%c14, %c0_28, %c0_29] : memref<22x8x128xf32, #tpu.memory_space<vmem>>, vector<1x8x128xf32>
    %43 = vector.shape_cast %42 : vector<1x8x128xf32> to vector<8x128xf32>
    %44 = arith.mulf %41, %43 : vector<8x128xf32>
    %c15 = arith.constant 15 : index
    %c0_30 = arith.constant 0 : index
    %c0_31 = arith.constant 0 : index
    %45 = vector.load %arg1[%c15, %c0_30, %c0_31] : memref<22x8x128xf32, #tpu.memory_space<vmem>>, vector<1x8x128xf32>
    %46 = vector.shape_cast %45 : vector<1x8x128xf32> to vector<8x128xf32>
    %c16 = arith.constant 16 : index
    %c0_32 = arith.constant 0 : index
    %c0_33 = arith.constant 0 : index
    %47 = vector.load %arg1[%c16, %c0_32, %c0_33] : memref<22x8x128xf32, #tpu.memory_space<vmem>>, vector<1x8x128xf32>
    %48 = vector.shape_cast %47 : vector<1x8x128xf32> to vector<8x128xf32>
    %49 = arith.mulf %46, %48 : vector<8x128xf32>
    %c17 = arith.constant 17 : index
    %c0_34 = arith.constant 0 : index
    %c0_35 = arith.constant 0 : index
    %50 = vector.load %arg1[%c17, %c0_34, %c0_35] : memref<22x8x128xf32, #tpu.memory_space<vmem>>, vector<1x8x128xf32>
    %51 = vector.shape_cast %50 : vector<1x8x128xf32> to vector<8x128xf32>
    %c18 = arith.constant 18 : index
    %c0_36 = arith.constant 0 : index
    %c0_37 = arith.constant 0 : index
    %52 = vector.load %arg1[%c18, %c0_36, %c0_37] : memref<22x8x128xf32, #tpu.memory_space<vmem>>, vector<1x8x128xf32>
    %53 = vector.shape_cast %52 : vector<1x8x128xf32> to vector<8x128xf32>
    %54 = arith.addf %51, %53 : vector<8x128xf32>
    %c19 = arith.constant 19 : index
    %c0_38 = arith.constant 0 : index
    %c0_39 = arith.constant 0 : index
    %55 = vector.load %arg1[%c19, %c0_38, %c0_39] : memref<22x8x128xf32, #tpu.memory_space<vmem>>, vector<1x8x128xf32>
    %56 = vector.shape_cast %55 : vector<1x8x128xf32> to vector<8x128xf32>
    %57 = arith.addf %54, %56 : vector<8x128xf32>
    %c20 = arith.constant 20 : index
    %c0_40 = arith.constant 0 : index
    %c0_41 = arith.constant 0 : index
    %58 = vector.load %arg1[%c20, %c0_40, %c0_41] : memref<22x8x128xf32, #tpu.memory_space<vmem>>, vector<1x8x128xf32>
    %59 = vector.shape_cast %58 : vector<1x8x128xf32> to vector<8x128xf32>
    %c21 = arith.constant 21 : index
    %c0_42 = arith.constant 0 : index
    %c0_43 = arith.constant 0 : index
    %60 = vector.load %arg1[%c21, %c0_42, %c0_43] : memref<22x8x128xf32, #tpu.memory_space<vmem>>, vector<1x8x128xf32>
    %61 = vector.shape_cast %60 : vector<1x8x128xf32> to vector<8x128xf32>
    %62 = arith.mulf %59, %61 : vector<8x128xf32>
    %63 = arith.addf %44, %49 : vector<8x128xf32>
    %64 = arith.addf %63, %57 : vector<8x128xf32>
    %65 = arith.addf %64, %62 : vector<8x128xf32>
    %cst_44 = arith.constant 9.99999997E-7 : f32
    %66 = vector.broadcast %cst_44 : f32 to vector<8x128xf32>
    %67 = arith.addf %65, %66 : vector<8x128xf32>
    %68 = arith.divf %39, %67 : vector<8x128xf32>
    %c0_45 = arith.constant 0 : index
    %c0_46 = arith.constant 0 : index
    %69 = vector.load %arg2[%c0_45, %c0_46] : memref<8x128xf32, #tpu.memory_space<vmem>>, vector<8x128xf32>
    tpu.vector_store %arg2[%c0_45, %c0_46], %68 {strides = array<i32>} : memref<8x128xf32, #tpu.memory_space<vmem>>, vector<8x128xf32>,
    return
  }
  func.func @transform_0(%arg0: i32) -> (i32, i32, i32) {
    %c0_i32 = arith.constant 0 : i32
    %c0_i32_0 = arith.constant 0 : i32
    %c0_i32_1 = arith.constant 0 : i32
    return %c0_i32, %arg0, %c0_i32_0 : i32, i32, i32
  }
  func.func @transform_1(%arg0: i32) -> (i32, i32) {
    %c0_i32 = arith.constant 0 : i32
    %c0_i32_0 = arith.constant 0 : i32
    return %arg0, %c0_i32 : i32, i32
  }
}

</mosaic_0001>

<bundles_post_ra>
// kernel: tpu_custom_call.1
= control target key start
LH: loop header
LB: loop body
LE: loop exit
PB: predicated region body
PF: predicated region fallthrough
CT: control target
= control target key end

     0   :  { %6 = vsyncpa [#allocation3], 0  ;;  %s664_s0 = inlined_call_operand.hbm [shape: f32[22,16,128], index: 0, kind: input, shape index: {}]   ;;  %s665_s1 = inlined_call_operand.hbm [shape: f32[16,128], index: 1, kind: output, shape index: {}]  }
   0x1   :  { %8 = vsyncpa [#allocation3 + $0x1], 0 }
   0x2   :  { %9 = vsyncpa [#allocation4], 0 }
   0x3   :  { %11 = vsyncpa [#allocation4 + $0x1], 0  ;;  %s483_s6 = smov 0   ;;  %s485_s7 = smov 0  }
   0x4   :  { %s487_s8 = smov 0   ;;  %s489_s9 = smov 0  }
   0x5 LB: > { %s504_s10 = sadd.s32 4294967295, %s466_s9   ;;  %s286_s11 = sadd.s32 4294967294, %s466_s9   ;;  %s466_s9 = sphi %s489_s9, %s678_s9   ;;  %s462_s8 = sphi %s487_s8, %s677_s8   ;;  %s458_s7 = sphi %s485_s7, %s676_s7   ;;  %s454_s6 = sphi %s483_s6, %s675_s6  }
   0x6   : > { %s508_s12 = sadd.s32 1, %s466_s9   ;;  %s24_s13 = sadd.s32 1, %s462_s8 }
   0x7   : > { %s21_s14 = ssub.s32 %s466_s9, %s508_s12  ;;  %p31_p0 = scmp.ne.s32.totalorder %s462_s8, %s458_s7 }
   0x8   : > { %p22_p1 = scmp.eq.s32.totalorder %s21_s14, 0  ;;  %p32_p2 = scmp.eq.s32.totalorder %s466_s9, 0 }
   0x9   : > { %p37_p3 = scmp.ne.s32.totalorder %s458_s7, %s454_s6  ;;  %p38_p4 = scmp.eq.s32.totalorder %s504_s10, 0 }
   0xa   : > { %s520_s15 = scalar_select %p22_p1, %s462_s8, %s24_s13  }
   0xb   : > { %p33_p5 = por %p32_p2, %p31_p0  ;;  %p522_p6 = por %p38_p4, %p37_p3 }
   0xc   : > { %p61_p7 = scmp.eq.s32.totalorder %s504_s10, 1  ;;  %p67_p8 = scmp.eq.s32.totalorder %s286_s11, 1 }
   0xd   : > { %p331_p10 = scmp.lt.s32.totalorder %s466_s9, 2  ;;  %s87_s19 = sand.u32 1, %s462_s8  }
   0xe   : > { %p529_p11 = por %p61_p7, %p31_p0  ;;  %p533_p12 = por %p67_p8, %p37_p3 }
   0xf   : > { %s289_s20 = sshll.u32 %s466_s9, 7  ;;  %s317_s21 = smul.u32 176, %s87_s19 }
  0x10   : > { %s668_s17 = scalar_select %p529_p11, 1, 0 }
  0x11   : > { %s669_s18 = scalar_select %p533_p12, 1, 0 }
  0x12   : > { %s542_s24 = scalar_lea.hbm %s664_s0, %s289_s20  ;;  %p544_p13 = pnand %p331_p10, %p33_p5 }
  0x13   : > { %s91_s26 = scalar_lea.vmem [#allocation2], %s317_s21  ;;  %s551_s28 = scalar_lea.sflag [#allocation3], %s87_s19 }
  0x14   : > { %s97_s27 = sshll.u32 %s91_s26, 4  ;;  %s370_s29 = scalar_lea.hbm %s542_s24, 2816  ;;  %s548_s27 = int_to_ptr.vmem [resolvable:$true] %s97_s27 }
  0x15   : > { %p371_p1 = scmp.ne.s32.totalorder %s542_s24, %s370_s29  ;;  %p372_p2 = pneg %p544_p13 }
  0x16   : > { %s375_s3 = scalar_lea.hbm %s664_s0, 5632  ;;  %p376_p5 = scmp.lt.u32.totalorder %s542_s24, %s664_s0 }
  0x17   : > { %p373_p3 = pnand %p372_p2, %p371_p1  ;;  %p377_p7 = scmp.lt.u32.totalorder %s375_s3, %s370_s29 }
  0x18   : > { %p379_p10 = scmp.lt.u32.totalorder %s370_s29, %s542_s24 }
  0x19   : > { %p374_p4 = pneg %p373_p3  ;;  %p378_p8 = por %p377_p7, %p376_p5 }
  0x1b   : > { %p380_p9 = por %p379_p10, %p378_p8 }
  0x1d   : > { %p381_p0 = pnand %p380_p9, %p374_p4 }
  0x1f   : > { %384 = shalt.err (!%p381_p0)
}
  0x20   : > { %s385_s11 = scalar_lea.vmem %s548_s27, 2816  ;;  %s468_s13 = smov [#allocation2]  }
  0x21   : > { %p386_p1 = scmp.ne.s32.totalorder %s548_s27, %s385_s11  ;;  %s390_s14 = sshll.u32 %s468_s13, 4  ;;  %s391_s14 = int_to_ptr.vmem [resolvable:$false] %s390_s14 }
  0x22   : > { %s392_s19 = scalar_lea.vmem %s391_s14, 5632  ;;  %p393_p11 = scmp.lt.s32.totalorder %s548_s27, %s391_s14 }
  0x23   : > { %p388_p3 = pnand %p386_p1, %p372_p2  ;;  %p394_p5 = scmp.lt.s32.totalorder %s392_s19, %s385_s11 }
  0x25   : > { %p389_p12 = pneg %p388_p3  ;;  %p395_p7 = por %p394_p5, %p393_p11 }
  0x27   : > { %p396_p8 = pnand %p395_p7, %p389_p12 }
  0x29   : > { %399 = shalt.err (!%p396_p8)
}
  0x2a   : > { %s469_s20 = smov 256   ;;  %s470_s21 = smov 128  }
  0x2b   : > { %s471_s22 = smov 8   ;;  %p105_p9 = scmp.lt.s32.totalorder %s466_s9, 3 }
  0x2c   : > { %326 = dma.hbm_to_vmem [thread:$0]  (!%p544_p13), %s542_s24, 2816, %s548_s27, %s551_s28, %s469_s20, %s470_s21, %s471_s22  }
  0x2d   : > { %p671_p0 = scmp.ge.s32.totalorder %s466_s9, 1 }
  0x2f   : > { %p106_p2 = pnand %p671_p0, %p105_p9 }
  0x30   : > { %s583_s23 = sand.u32 (!%p106_p2), 1, %s458_s7  }
  0x31   : > { %109 = sbr.rel (%p106_p2) target bundleno = 100 (0x64), region = 24  ;;  %s112_s29 = scalar_lea.sflag (!%p106_p2), [#allocation3], %s583_s23 }
  0x32   : > { %s318_s26 = smul.u32 (!%p106_p2), 176, %s583_s23 }
  0x34   : > { %s587_s30 = scalar_lea.vmem (!%p106_p2), [#allocation2], %s318_s26 }
  0x38   : > { %445 = dma.done.wait (%p522_p6), %s112_s29, 2816  }
  0x39   : > { %447 = vsyncadd (%p522_p6), %s112_s29, 4294964480  ;;  %v134_v0 = vld [vmem:[%s587_s30] sm:$0xff]  ;;  %v292_v1 = vld [vmem:[%s587_s30 + $0x8] sm:$0xff]  ;;  %s291_s16 = sshll.u32 %s583_s23, 3  ;;  %s314_s27 = sshll.u32 %s504_s10, 7 }
  0x3a   : > { %v293_v2 = vld [vmem:[%s587_s30 + $0x10] sm:$0xff]  ;;  %v137_v3 = vadd.f32 %v292_v1, %v134_v0  ;;  %v294_v4 = vld [vmem:[%s587_s30 + $0x18] sm:$0xff]  ;;  %v295_v5 = vld [vmem:[%s587_s30 + $0x20] sm:$0xff]  ;;  %s133_s24 = scalar_lea.vmem [#allocation5], %s291_s16  ;;  %s622_s3 = scalar_lea.hbm %s665_s1, %s314_s27 }
  0x3b   : > { %v296_v6 = vld [vmem:[%s587_s30 + $0x28] sm:$0xff]  ;;  %v145_v7 = vadd.f32 %v295_v5, %v294_v4  ;;  %v297_v8 = vld [vmem:[%s587_s30 + $0x30] sm:$0xff]  ;;  %v298_v9 = vld [vmem:[%s587_s30 + $0x38] sm:$0xff]  ;;  %s216_s25 = sshll.u32 %s133_s24, 4  ;;  %s203_s4 = scalar_lea.sflag [#allocation4], %s583_s23  ;;  %s617_s25 = int_to_ptr.vmem [resolvable:$true] %s216_s25 }
  0x3c   : > { %v299_v10 = vld [vmem:[%s587_s30 + $0x40] sm:$0xff]  ;;  %v140_v11 = vadd.f32 %v293_v2, %v137_v3  ;;  %v300_v13 = vld [vmem:[%s587_s30 + $0x48] sm:$0xff]  ;;  %v305_v15 = vld [vmem:[%s587_s30 + $0x70] sm:$0xff]  ;;  %v153_v26 = vadd.f32 %v298_v9, %v297_v8  ;;  %s400_s5 = scalar_lea.vmem %s617_s25, 128  ;;  %p672_p11 = scmp.ne.s32.totalorder %s668_s17, 0 }
  0x3d   : > { %v148_v12 = vadd.f32 %v296_v6, %v145_v7  ;;  %v304_v14 = vld [vmem:[%s587_s30 + $0x68] sm:$0xff]  ;;  %v306_v17 = vld [vmem:[%s587_s30 + $0x78] sm:$0xff]  ;;  %v307_v18 = vld [vmem:[%s587_s30 + $0x80] sm:$0xff]  ;;  %v158_v27 = vadd.f32 %v300_v13, %v299_v10  ;;  %p401_p6 = scmp.ne.s32.totalorder %s617_s25, %s400_s5  ;;  %s472_s10 = smov [#allocation5]  }
  0x3e   : > { %v176_v16 = vmul.f32 %v305_v15, %v304_v14  ;;  %v308_v19 = vld [vmem:[%s587_s30 + $0x88] sm:$0xff]  ;;  %v181_v20 = vmul.f32 %v307_v18, %v306_v17  ;;  %v309_v21 = vld [vmem:[%s587_s30 + $0x90] sm:$0xff]  ;;  %v310_v22 = vld [vmem:[%s587_s30 + $0x98] sm:$0xff]  ;;  %s404_s11 = sshll.u32 %s472_s10, 4  ;;  %s405_s11 = int_to_ptr.vmem [resolvable:$false] %s404_s11 }
  0x3f   : > { %v311_v23 = vld [vmem:[%s587_s30 + $0xa0] sm:$0xff]  ;;  %v186_v24 = vadd.f32 %v309_v21, %v308_v19  ;;  %v312_v25 = vld [vmem:[%s587_s30 + $0xa8] sm:$0xff]  ;;  %v167_v28 = vmul.f32 %v148_v12, %v140_v11  ;;  %v301_v30 = vld [vmem:[%s587_s30 + $0x50] sm:$0xff]  ;;  %p402_p12 = pnand %p401_p6, %p672_p11  ;;  %s406_s13 = scalar_lea.vmem %s405_s11, 256 }
  0x40   : > { %v195_v29 = vadd.f32 %v181_v20, %v176_v16  ;;  %v194_v32 = vmul.f32 %v312_v25, %v311_v23  ;;  %v161_v34 = vadd.f32 %v301_v30, %v158_v27  ;;  %v302_v36 = vld [vmem:[%s587_s30 + $0x58] sm:$0xff]  ;;  %v303_v37 = vld [vmem:[%s587_s30 + $0x60] sm:$0xff]  ;;  %p407_p4 = scmp.lt.s32.totalorder %s617_s25, %s405_s11  ;;  %p408_p10 = scmp.lt.s32.totalorder %s406_s13, %s400_s5 }
  0x41   : > { %v189_v31 = vadd.f32 %v310_v22, %v186_v24  ;;  %v168_v35 = vmul.f32 %v167_v28, %v153_v26  ;;  %v166_v40 = vadd.f32 %v303_v37, %v302_v36  ;;  %p403_p13 = pneg %p402_p12 }
  0x42   : > { %p409_p1 = por %p408_p10, %p407_p4 }
  0x43   : > { %v196_v33 = vadd.f32 %v195_v29, %v189_v31  ;;  %v169_v41 = vmul.f32 %v168_v35, %v161_v34 }
  0x44   : > { %p410_p3 = pnand %p409_p1, %p403_p13 }
  0x45   : > { %v197_v38 = vadd.f32 %v196_v33, %v194_v32  ;;  %v170_v42 = vmul.f32 %v169_v41, %v166_v40 }
  0x47   : > { %v198_v39 = vadd.f32 1e-06, %v197_v38  ;;  %v171_v43 = vmul.f32 0.027777778, %v170_v42 }
  0x49   : > { %368 = vrcp.f32 %v198_v39 }
  0x53   : > { %v369_v44 = vpop.eup %368 }
  0x54   : > { %v200_v45 = vmul.f32 %v369_v44, %v171_v43 }
  0x56   : > { %201 = vst [vmem:[%s133_s24] sm:$0xff] %v200_v45 }
  0x57   : > { %413 = shalt.err (!%p410_p3)
}
  0x58   : > { %s414_s14 = scalar_lea.hbm %s622_s3, 128  ;;  %s418_s21 = scalar_lea.hbm %s665_s1, 256 }
  0x59   : > { %p415_p5 = scmp.ne.s32.totalorder %s622_s3, %s414_s14  ;;  %p419_p9 = scmp.lt.u32.totalorder %s622_s3, %s665_s1 }
  0x5a   : > { %p420_p0 = scmp.lt.u32.totalorder %s418_s21, %s414_s14  ;;  %p422_p6 = scmp.lt.u32.totalorder %s414_s14, %s622_s3 }
  0x5b   : > { %p416_p7 = pnand %p415_p5, %p672_p11 }
  0x5c   : > { %p421_p2 = por %p420_p0, %p419_p9 }
  0x5d   : > { %p417_p8 = pneg %p416_p7 }
  0x5e   : > { %p423_p12 = por %p422_p6, %p421_p2 }
  0x60   : > { %p424_p13 = pnand %p423_p12, %p417_p8 }
  0x62   : > { %427 = shalt.err (!%p424_p13)
}
  0x63   : > { %321 = dma.vmem_to_hbm [thread:$0]  (%p672_p11), %s617_s25, 128, %s622_s3, %s203_s4  }
  0x64 PF: > { %s228_s26 = sand.u32 1, %s454_s6   ;;  %p673_p4 = scmp.ne.s32.totalorder %s669_s18, 0 }
  0x65   : > { %p674_p10 = scmp.ge.s32.totalorder %s466_s9, 2  ;;  %s229_s29 = scalar_lea.sflag [#allocation4], %s228_s26 }
  0x67   : > { %p328_p1 = pnand %p674_p10, %p673_p4 }
  0x69   : > { %449 = dma.done.wait (!%p328_p1), %s229_s29, 128  }
  0x6a   : > { %451 = vsyncadd (!%p328_p1), %s229_s29, 4294967168  ;;  %p14_p3 = scmp.ge.s32.totalorder %s508_s12, 4   ;;  %s675_s6 = smov %s458_s7 }
  0x6b   : > { %s676_s7 = smov %s462_s8  ;;  %s677_s8 = smov %s520_s15 }
  0x6c   : > { %s678_s9 = smov %s508_s12  ;;  %16 = sbr.rel (!%p14_p3) target bundleno = 5 (0x5), region = 90 }
  0x73   :  { %234 = vsyncpa [#allocation3], 1 }
  0x74   :  { %236 = vsyncpa [#allocation3 + $0x1], 1 }
  0x75   :  { %237 = vsyncpa [#allocation4], 1 }
  0x76   :  { %239 = vsyncpa [#allocation4 + $0x1], 1 }

</bundles_post_ra>
